<compile_context>
chip_gen: v6e
topology: v6e:2x2x1
jax: 0.10.0
libtpu: 0.0.40
codegen_flags: <defaults>
</compile_context>

<pallas_src>
from functools import partial

import jax
import jax.numpy as jnp
from jax import lax
from jax.experimental import pallas as pl
from jax.experimental.pallas import tpu as pltpu


# ---------------------------------------------------------------------------
# Pallas kernel
# ---------------------------------------------------------------------------

def _sdpa_kernel(q_ref, k_ref, v_ref, *out_refs, mxu_dtype, return_attention):
    """One grid step processes G batch rows x TQ query rows.

    q: (G, TQ, D), k: (G, Lk, D), v: (G, Lk, Dv)
    out: ctx (G, TQ, Dv) [, attn (G, TQ, Lk)]
    """
    q = q_ref[...]
    k = k_ref[...]
    v = v_ref[...]

    # MXU operands in the requested dtype (bf16 fast path / f32 faithful path);
    # accumulation is always f32.
    qm = q.astype(mxu_dtype)
    km = k.astype(mxu_dtype)

    # scores: contract last dim of q with last dim of k, batched over G.
    # Transposed-RHS contraction -> MXU consumes k directly, no XLU transpose.
    s = lax.dot_general(
        qm, km,
        dimension_numbers=(((2,), (2,)), ((0,), (0,))),
        preferred_element_type=jnp.float32,
    )  # (G, TQ, Lk) f32

    # Numerically-stable, EXACT softmax in f32 (VPU/EUP). The previous
    # approx-reciprocal normalization broke the context tolerance.
    m = jnp.max(s, axis=-1, keepdims=True)
    e = jnp.exp(s - m)
    denom = jnp.sum(e, axis=-1, keepdims=True)
    p = e / denom  # rows sum to 1 (up to f32 rounding)

    ctx = lax.dot_general(
        p.astype(mxu_dtype), v.astype(mxu_dtype),
        dimension_numbers=(((2,), (1,)), ((0,), (0,))),
        preferred_element_type=jnp.float32,
    )  # (G, TQ, Dv) f32

    ctx_ref = out_refs[0]
    ctx_ref[...] = ctx.astype(ctx_ref.dtype)
    if return_attention:
        attn_ref = out_refs[1]
        attn_ref[...] = p.astype(attn_ref.dtype)


# ---------------------------------------------------------------------------
# Block-size / VMEM heuristics
# ---------------------------------------------------------------------------

def _vmem_plan():
    """Returns (working-set budget for block sizing, scoped-VMEM limit to request).

    Picked per chip generation when a TPU is visible; conservative fallback
    otherwise (safe on v5e / v6e / v7x and in interpret mode).
    """
    phys = None
    try:
        info = pltpu.get_tpu_info()
        phys = getattr(info, "vmem_capacity_bytes", None)
    except Exception:
        phys = None
    if phys is None:
        return 16 << 20, 32 << 20           # unknown backend: safe everywhere
    if phys <= (64 << 20):                  # v7x-class: 64 MiB physical per TC
        return 20 << 20, 44 << 20
    return 28 << 20, 48 << 20               # v5e / v6e: 128 MiB physical


def _pick_blocks(B, Lq, Lk, D, Dv, in_itemsize, out_itemsize, return_attention,
                 budget_bytes, block_b=None, block_q=None):
    """Choose (batch block G, Lq tile TQ) so the working set fits the budget."""
    # --- Lq tile: full Lq unless it is large; tile must divide Lq and be a
    #     multiple of 8 (sublane rule) unless it equals Lq.
    if block_q is not None:
        TQ = block_q
    else:
        TQ = Lq
        if Lq > 512:
            for d in range(512, 7, -1):
                if Lq % d == 0 and d % 8 == 0:
                    TQ = d
                    break
    assert Lq % TQ == 0 and (TQ == Lq or TQ % 8 == 0)

    def per_batch_bytes(tq):
        io_in = tq * D + Lk * D + Lk * Dv
        io_out = tq * Dv + (tq * Lk if return_attention else 0)
        # double-buffered pipeline copies of every blocked operand
        pipelined = 2 * (in_itemsize * io_in + out_itemsize * io_out)
        # f32 in-kernel temporaries: scores, exp, probs (+ ctx accumulator slack)
        temps = 4 * (3 * tq * Lk + 2 * tq * Dv)
        return pipelined + temps

    if block_b is not None:
        G = block_b
    else:
        cap = max(1, budget_bytes // max(per_batch_bytes(TQ), 1))
        G = max(1, min(B, cap))
        while B % G != 0:
            G -= 1
        # v7x has 2 TensorCores; make sure the "parallel" grid has >= 2 steps
        # to shard. Negligible cost on 1-TC v5e/v6e, free ~2x on v7x.
        if (B // G) * (Lq // TQ) < 2 and B >= 2:
            G = B // 2
            while B % G != 0:
                G -= 1
            G = max(1, G)
    assert B % G == 0
    return G, TQ


# ---------------------------------------------------------------------------
# Wrapper
# ---------------------------------------------------------------------------

def pallas_sdpa(q, k, v, *, block_b=None, block_q=None, mxu_dtype=None,
                return_attention=True):
    """q: (B, Lq, D), k: (B, Lk, D), v: (B, Lk, Dv).

    Returns (context (B, Lq, Dv), attention (B, Lq, Lk)) in the input dtype,
    or just context if return_attention=False.
    """
    B, Lq, D = q.shape
    Bk, Lk, Dk = k.shape
    Bv, Lv, Dv = v.shape
    assert B == Bk == Bv and D == Dk and Lk == Lv

    in_dtype = q.dtype
    assert k.dtype == in_dtype and v.dtype == in_dtype
    out_dtype = in_dtype

    if mxu_dtype is None:
        # Accuracy contract: <=16-bit float inputs use the fast bf16-class MXU
        # path; f32 inputs keep faithful f32 matmul semantics. Pass
        # mxu_dtype=jnp.bfloat16 to opt f32 inputs into the fast path.
        mxu_dtype = in_dtype if jnp.dtype(in_dtype).itemsize <= 2 else jnp.float32

    budget, vmem_limit = _vmem_plan()
    in_itemsize = jnp.dtype(in_dtype).itemsize
    out_itemsize = jnp.dtype(out_dtype).itemsize
    G, TQ = _pick_blocks(B, Lq, Lk, D, Dv, in_itemsize, out_itemsize,
                         return_attention, budget, block_b, block_q)

    # qi is the inner grid axis, so the k/v blocks (fixed per batch block) stay
    # resident across it — no redundant DMA.
    grid = (B // G, Lq // TQ)

    in_specs = [
        pl.BlockSpec((G, TQ, D), lambda b, qi: (b, qi, 0)),
        pl.BlockSpec((G, Lk, D), lambda b, qi: (b, 0, 0)),
        pl.BlockSpec((G, Lk, Dv), lambda b, qi: (b, 0, 0)),
    ]
    ctx_spec = pl.BlockSpec((G, TQ, Dv), lambda b, qi: (b, qi, 0))
    ctx_shape = jax.ShapeDtypeStruct((B, Lq, Dv), out_dtype)

    flops = 2 * B * Lq * Lk * (D + Dv)
    bytes_accessed = (
        in_itemsize * (q.size + k.size + v.size)
        + out_itemsize * (B * Lq * Dv + (B * Lq * Lk if return_attention else 0))
    )
    cost = pl.CostEstimate(flops=flops, transcendentals=B * Lq * Lk,
                           bytes_accessed=bytes_accessed)

    kernel = partial(_sdpa_kernel, mxu_dtype=mxu_dtype,
                     return_attention=return_attention)
    params = pltpu.CompilerParams(
        dimension_semantics=("parallel", "parallel"),
        vmem_limit_bytes=vmem_limit,
    )

    if return_attention:
        out_shape = (ctx_shape, jax.ShapeDtypeStruct((B, Lq, Lk), out_dtype))
        out_specs = (ctx_spec,
                     pl.BlockSpec((G, TQ, Lk), lambda b, qi: (b, qi, 0)))
        ctx, attn = pl.pallas_call(
            kernel, grid=grid, out_shape=out_shape,
            in_specs=in_specs, out_specs=out_specs,
            compiler_params=params, cost_estimate=cost,
        )(q, k, v)
        return ctx, attn
    else:
        ctx = pl.pallas_call(
            kernel, grid=grid, out_shape=ctx_shape,
            in_specs=in_specs, out_specs=ctx_spec,
            compiler_params=params, cost_estimate=cost,
        )(q, k, v)
        return ctx


class ScaledDotProductAttentionPallas:
    """Mirrors the PyTorch ScaledDotProductAttention forward (eval mode)."""

    def __init__(self, attention_dropout=0.1):
        self.dropout_p = attention_dropout  # identity at inference

    def __call__(self, q, k, v, scale=None, attn_mask=None, bias=None):
        # `scale` is dead code in the PyTorch reference (its effect is
        # immediately overwritten by the q @ k^T matmul), so it is ignored.
        # TODO(synk): attn_mask / bias branches not implemented (None here).
        assert attn_mask is None and bias is None
        # No forced f32 upcast — bf16 inputs stay bf16 in HBM and on the MXU.
        q = jnp.asarray(q)
        k = jnp.asarray(k)
        v = jnp.asarray(v)
        return pallas_sdpa(q, k, v)


# ---------------------------------------------------------------------------
# Pure-JAX reference (for correctness check)
# ---------------------------------------------------------------------------

def reference_sdpa(q, k, v):
    qf = q.astype(jnp.float32)
    kf = k.astype(jnp.float32)
    vf = v.astype(jnp.float32)
    s = jnp.einsum("bqd,bkd->bqk", qf, kf, precision="highest")
    p = jax.nn.softmax(s, axis=-1)
    ctx = jnp.einsum("bqk,bkd->bqd", p, vf, precision="highest")
    return ctx, p


# ---------------------------------------------------------------------------
# Main
# ---------------------------------------------------------------------------

if __name__ == "__main__":
    # --- Test 1: small f32 shapes consistent with the module (B=2, L=8, D=32).
    B, L, D = 2, 8, 32
    kq, kk, kv = jax.random.split(jax.random.PRNGKey(0), 3)
    q = jax.random.normal(kq, (B, L, D), jnp.float32)
    k = jax.random.normal(kk, (B, L, D), jnp.float32)
    v = jax.random.normal(kv, (B, L, D), jnp.float32)

    sdpa = ScaledDotProductAttentionPallas()
    ctx, attn = sdpa(q, k, v)
    ctx = jax.block_until_ready(ctx)
    attn = jax.block_until_ready(attn)

    ref_ctx, ref_attn = reference_sdpa(q, k, v)
    assert ctx.shape == (B, L, D) and attn.shape == (B, L, L)
    assert jnp.allclose(attn, ref_attn, atol=2e-3, rtol=2e-3)
    assert jnp.allclose(ctx, ref_ctx, atol=2e-3, rtol=2e-3)

    # --- Test 2: bf16 fast path (bf16 MXU operands, bf16 outputs) on larger
    #             shapes; exercises the batch-blocked grid (>= 2 steps).
    B2, L2, D2 = 8, 256, 64
    q2 = jax.random.normal(jax.random.PRNGKey(1), (B2, L2, D2)).astype(jnp.bfloat16)
    k2 = jax.random.normal(jax.random.PRNGKey(2), (B2, L2, D2)).astype(jnp.bfloat16)
    v2 = jax.random.normal(jax.random.PRNGKey(3), (B2, L2, D2)).astype(jnp.bfloat16)
    ctx2, attn2 = pallas_sdpa(q2, k2, v2)
    ctx2 = jax.block_until_ready(ctx2)
    attn2 = jax.block_until_ready(attn2)
    assert ctx2.dtype == jnp.bfloat16 and attn2.dtype == jnp.bfloat16
    ref_ctx2, ref_attn2 = reference_sdpa(q2, k2, v2)
    assert jnp.allclose(attn2.astype(jnp.float32), ref_attn2, atol=2e-2, rtol=2e-2)
    assert jnp.allclose(ctx2.astype(jnp.float32), ref_ctx2, atol=2e-2, rtol=2e-2)

    # --- Test 3: context-only path (skips the dominant (B, Lq, Lk) HBM write).
    ctx3 = pallas_sdpa(q2, k2, v2, return_attention=False)
    ctx3 = jax.block_until_ready(ctx3)
    assert jnp.allclose(ctx3.astype(jnp.float32), ctx2.astype(jnp.float32),
                        atol=1e-3, rtol=1e-3)

    print("KERNEL_OK")
</pallas_src>

<mosaic_0001>
module attributes {stable_mosaic.version = 11 : i64} {
  func.func @_sdpa_kernel(%arg0: i32, %arg1: i32, %arg2: memref<1x8x32xf32, #tpu.memory_space<vmem>>, %arg3: memref<1x8x32xf32, #tpu.memory_space<vmem>>, %arg4: memref<1x8x32xf32, #tpu.memory_space<vmem>>, %arg5: memref<1x8x32xf32, #tpu.memory_space<vmem>>, %arg6: memref<1x8x8xf32, #tpu.memory_space<vmem>>) attributes {dimension_semantics = [#tpu.dimension_semantics<parallel>, #tpu.dimension_semantics<parallel>], iteration_bounds = array<i64: 2, 1>, scalar_prefetch = 0 : i64, scratch_operands = 0 : i64, tpu.core_type = #tpu.core_type<tc>, window_params = [{transform_indices = @transform_0, window_bounds = array<i64: 1, 8, 32>}, {transform_indices = @transform_1, window_bounds = array<i64: 1, 8, 32>}, {transform_indices = @transform_2, window_bounds = array<i64: 1, 8, 32>}, {transform_indices = @transform_3, window_bounds = array<i64: 1, 8, 32>}, {transform_indices = @transform_4, window_bounds = array<i64: 1, 8, 8>}]} {
    %c0 = arith.constant 0 : index
    %c0_0 = arith.constant 0 : index
    %c0_1 = arith.constant 0 : index
    %0 = vector.load %arg2[%c0, %c0_0, %c0_1] : memref<1x8x32xf32, #tpu.memory_space<vmem>>, vector<1x8x32xf32>
    %c0_2 = arith.constant 0 : index
    %c0_3 = arith.constant 0 : index
    %c0_4 = arith.constant 0 : index
    %1 = vector.load %arg3[%c0_2, %c0_3, %c0_4] : memref<1x8x32xf32, #tpu.memory_space<vmem>>, vector<1x8x32xf32>
    %c0_5 = arith.constant 0 : index
    %c0_6 = arith.constant 0 : index
    %c0_7 = arith.constant 0 : index
    %2 = vector.load %arg4[%c0_5, %c0_6, %c0_7] : memref<1x8x32xf32, #tpu.memory_space<vmem>>, vector<1x8x32xf32>
    %cst = arith.constant dense<0.000000e+00> : vector<1x8x8xf32>
    %3 = tpu.matmul %0, %1, %cst {dimension_numbers = #tpu.dot_dimension_numbers<[2], [2], [1], [1], [0, 0, 0, 1, 1, 1], [0], [0]>} : vector<1x8x32xf32>, vector<1x8x32xf32>, vector<1x8x8xf32> -> vector<1x8x8xf32>
    %cst_8 = arith.constant dense<0xFF800000> : vector<1x8xf32>
    %4 = vector.multi_reduction <maximumf>, %3, %cst_8 [2] : vector<1x8x8xf32> to vector<1x8xf32>
    %5 = vector.shape_cast %4 : vector<1x8xf32> to vector<1x8x1xf32>
    %6 = vector.broadcast %5 : vector<1x8x1xf32> to vector<1x8x8xf32>
    %7 = arith.subf %3, %6 : vector<1x8x8xf32>
    %8 = math.exp %7 : vector<1x8x8xf32>
    %cst_9 = arith.constant dense<0.000000e+00> : vector<1x8xf32>
    %9 = vector.multi_reduction <add>, %8, %cst_9 [2] : vector<1x8x8xf32> to vector<1x8xf32>
    %10 = vector.shape_cast %9 : vector<1x8xf32> to vector<1x8x1xf32>
    %11 = vector.broadcast %10 : vector<1x8x1xf32> to vector<1x8x8xf32>
    %12 = arith.divf %8, %11 : vector<1x8x8xf32>
    %cst_10 = arith.constant dense<0.000000e+00> : vector<1x8x32xf32>
    %13 = tpu.matmul %12, %2, %cst_10 {dimension_numbers = #tpu.dot_dimension_numbers<[2], [1], [1], [2], [0, 0, 0, 1, 1, 2], [0], [0]>} : vector<1x8x8xf32>, vector<1x8x32xf32>, vector<1x8x32xf32> -> vector<1x8x32xf32>
    %c0_11 = arith.constant 0 : index
    %c0_12 = arith.constant 0 : index
    %c0_13 = arith.constant 0 : index
    %14 = vector.load %arg5[%c0_11, %c0_12, %c0_13] : memref<1x8x32xf32, #tpu.memory_space<vmem>>, vector<1x8x32xf32>
    tpu.vector_store %arg5[%c0_11, %c0_12, %c0_13], %13 {strides = array<i32>} : memref<1x8x32xf32, #tpu.memory_space<vmem>>, vector<1x8x32xf32>,
    %c0_14 = arith.constant 0 : index
    %c0_15 = arith.constant 0 : index
    %c0_16 = arith.constant 0 : index
    %15 = vector.load %arg6[%c0_14, %c0_15, %c0_16] : memref<1x8x8xf32, #tpu.memory_space<vmem>>, vector<1x8x8xf32>
    tpu.vector_store %arg6[%c0_14, %c0_15, %c0_16], %12 {strides = array<i32>} : memref<1x8x8xf32, #tpu.memory_space<vmem>>, vector<1x8x8xf32>,
    return
  }
  func.func @transform_0(%arg0: i32, %arg1: i32) -> (i32, i32, i32) {
    %c0_i32 = arith.constant 0 : i32
    %c0_i32_0 = arith.constant 0 : i32
    return %arg0, %arg1, %c0_i32 : i32, i32, i32
  }
  func.func @transform_1(%arg0: i32, %arg1: i32) -> (i32, i32, i32) {
    %c0_i32 = arith.constant 0 : i32
    %c0_i32_0 = arith.constant 0 : i32
    %c0_i32_1 = arith.constant 0 : i32
    return %arg0, %c0_i32, %c0_i32_0 : i32, i32, i32
  }
  func.func @transform_2(%arg0: i32, %arg1: i32) -> (i32, i32, i32) {
    %c0_i32 = arith.constant 0 : i32
    %c0_i32_0 = arith.constant 0 : i32
    %c0_i32_1 = arith.constant 0 : i32
    return %arg0, %c0_i32, %c0_i32_0 : i32, i32, i32
  }
  func.func @transform_3(%arg0: i32, %arg1: i32) -> (i32, i32, i32) {
    %c0_i32 = arith.constant 0 : i32
    %c0_i32_0 = arith.constant 0 : i32
    return %arg0, %arg1, %c0_i32 : i32, i32, i32
  }
  func.func @transform_4(%arg0: i32, %arg1: i32) -> (i32, i32, i32) {
    %c0_i32 = arith.constant 0 : i32
    %c0_i32_0 = arith.constant 0 : i32
    return %arg0, %arg1, %c0_i32 : i32, i32, i32
  }
}

</mosaic_0001>

<bundles_post_ra>
// kernel: tpu_custom_call.1
= control target key start
LH: loop header
LB: loop body
LE: loop exit
PB: predicated region body
PF: predicated region fallthrough
CT: control target
= control target key end

     0   :  { %s1263_s0 = inlined_call_operand.hbm [shape: f32[2,8,32], index: 0, kind: input, shape index: {}]   ;;  %s1264_s1 = inlined_call_operand.hbm [shape: f32[2,8,32], index: 1, kind: input, shape index: {}]   ;;  %s1265_s2 = inlined_call_operand.hbm [shape: f32[2,8,32], index: 2, kind: input, shape index: {}]   ;;  %s1266_s3 = inlined_call_operand.hbm [shape: f32[2,8,32], index: 3, kind: output, shape index: {0}]   ;;  %s1267_s4 = inlined_call_operand.hbm [shape: f32[2,8,8], index: 4, kind: output, shape index: {1}]  }
   0x1   :  { %1271 = sst [smem:[#allocation18_spill]] %s1264_s1 }
   0x2   :  { %10 = vsyncpa [#allocation3], 0 }
   0x3   :  { %12 = vsyncpa [#allocation3 + $0x1], 0 }
   0x4   :  { %13 = vsyncpa [#allocation6], 0 }
   0x5   :  { %15 = vsyncpa [#allocation6 + $0x1], 0 }
   0x6   :  { %16 = vsyncpa [#allocation4], 0 }
   0x7   :  { %18 = vsyncpa [#allocation4 + $0x1], 0 }
   0x8   :  { %19 = vsyncpa [#allocation10], 0 }
   0x9   :  { %21 = vsyncpa [#allocation10 + $0x1], 0  ;;  %s1025_s15 = smov 0   ;;  %s1027_s16 = smov 0  }
   0xa   :  { %s1029_s17 = smov 0   ;;  %s1031_s18 = smov 0  }
   0xb   :  { %s1033_s19 = smov 0   ;;  %s1035_s20 = smov 0  }
   0xc LB: > { %1272 = sst [smem:[#allocation15_spill]] %s987_s19  ;;  %s1056_s21 = sadd.s32 4294967295, %s991_s20   ;;  %s991_s20 = sphi %s1035_s20, %s27_s20   ;;  %s987_s19 = sphi %s1033_s19, %s1286_s19   ;;  %s983_s18 = sphi %s1031_s18, %s1285_s18   ;;  %s979_s17 = sphi %s1029_s17, %s1289_s17   ;;  %s975_s16 = sphi %s1027_s16, %s1288_s16   ;;  %s971_s15 = sphi %s1025_s15, %s1287_s15  }
   0xd   : > { %s672_s22 = sadd.s32 4294967294, %s991_s20   ;;  %s39_s23 = sadd.s32 1, %s987_s19 }
   0xe   : > { %s48_s24 = sadd.s32 1, %s979_s17  ;;  %p41_p0 = scmp.ge.s32.totalorder %s39_s23, 2 }
   0xf   : > { %p55_p1 = scmp.ne.s32.totalorder %s979_s17, %s975_s16  ;;  %p56_p2 = scmp.eq.s32.totalorder %s991_s20, 0 }
  0x10   : > { %p61_p3 = scmp.ne.s32.totalorder %s975_s16, %s971_s15  ;;  %s1291_s23 = smov (%p41_p0, %s39_s23), 0 }
  0x11   : > { %1273 = sst [smem:[#allocation16_spill]] %s1291_s23  ;;  %p1068_p4 = por %p56_p2, %p55_p1 }
  0x12   : > { %p62_p5 = scmp.eq.s32.totalorder %s1056_s21, 0  ;;  %s43_s26 = ssub.s32 %s987_s19, %s1291_s23 }
  0x13   : > { %p139_p6 = scmp.eq.s32.totalorder %s1056_s21, 1  ;;  %p46_p7 = scmp.eq.s32.totalorder %s43_s26, 0 }
  0x14   : > { %p1076_p8 = por %p62_p5, %p61_p3  ;;  %p145_p10 = scmp.eq.s32.totalorder %s672_s22, 1 }
  0x15   : > { %p1080_p9 = por %p139_p6, %p55_p1  ;;  %p737_p13 = scmp.lt.s32.totalorder %s991_s20, 2 }
  0x16   : > { %s1085_s29 = scalar_select %p46_p7, %s979_s17, %s48_s24  }
  0x17   : > { %p1087_p11 = por %p145_p10, %p61_p3  ;;  %s1268_s5 = sand.u32 1, %s979_s17  }
  0x18   : > { %1277 = sst [smem:[#allocation17_spill]] %s1085_s29  ;;  %s1096_s6 = sshll.u32 %s1268_s5, 3 }
  0x19   : > { %s1099_s7 = sshll.u32 %s987_s19, 7  ;;  %p1103_p0 = pnand %p737_p13, %p1068_p4 }
  0x1a   : > { %s212_s9 = sand.u32 1, %s991_s20   ;;  %s1280_s1 = sld [smem:[#allocation18_spill]] }
  0x1b   : > { %s216_s13 = scalar_lea.vmem [#allocation5], %s1096_s6  ;;  %p681_p1 = scmp.ge.s32.totalorder %s991_s20, 1 }
  0x1c   : > { %s223_s14 = sshll.u32 %s216_s13, 4  ;;  %p246_p2 = scmp.lt.s32.totalorder %s991_s20, 3  ;;  %s224_s14 = int_to_ptr.vmem [resolvable:$true] %s223_s14 }
  0x1d   : > { %s1115_s22 = scalar_lea.sflag [#allocation6], %s212_s9  ;;  %p795_p3 = pneg %p1103_p0 }
  0x1e   : > { %s806_s24 = scalar_lea.vmem %s224_s14, 128  ;;  %s993_s25 = smov [#allocation5]  }
  0x1f   : > { %p807_p4 = scmp.ne.s32.totalorder %s224_s14, %s806_s24  ;;  %s811_s26 = sshll.u32 %s993_s25, 4  ;;  %s812_s26 = int_to_ptr.vmem [resolvable:$false] %s811_s26 }
  0x20   : > { %s221_s12 = scalar_lea.hbm %s1280_s1, %s1099_s7  ;;  %s813_s10 = scalar_lea.vmem %s812_s26, 256 }
  0x21   : > { %p809_p5 = pnand %p807_p4, %p795_p3  ;;  %p814_p7 = scmp.lt.s32.totalorder %s224_s14, %s812_s26 }
  0x22   : > { %p815_p10 = scmp.lt.s32.totalorder %s813_s10, %s806_s24 }
  0x23   : > { %p810_p6 = pneg %p809_p5 }
  0x24   : > { %p816_p13 = por %p815_p10, %p814_p7 }
  0x26   : > { %p817_p12 = pnand %p816_p13, %p810_p6 }
  0x28   : > { %820 = shalt.err (!%p817_p12)
}
  0x29   : > { %726 = dma.hbm_to_vmem [thread:$0]  (!%p1103_p0), %s221_s12, 128, %s224_s14, %s1115_s22  }
  0x2a   : > { %p1129_p4 = pnand %p681_p1, %p246_p2  ;;  %s203_s24 = scalar_lea.hbm %s1263_s0, %s1099_s7 }
  0x2b   : > { %s197_s25 = scalar_lea.vmem [#allocation2], %s1096_s6  ;;  %s239_s1 = scalar_lea.hbm %s1265_s2, %s1099_s7 }
  0x2c   : > { %s205_s26 = sshll.u32 %s197_s25, 4  ;;  %s1282_s23 = sand.u32 1, %s979_s17   ;;  %s206_s26 = int_to_ptr.vmem [resolvable:$true] %s205_s26 }
  0x2d   : > { %s194_s19 = scalar_lea.sflag [#allocation3], %s1282_s23  ;;  %s834_s12 = scalar_lea.vmem %s206_s26, 128 }
  0x2e   : > { %p835_p12 = scmp.ne.s32.totalorder %s206_s26, %s834_s12  ;;  %s994_s14 = smov [#allocation2]  }
  0x2f   : > { %s839_s29 = sshll.u32 %s994_s14, 4  ;;  %s840_s29 = int_to_ptr.vmem [resolvable:$false] %s839_s29 }
  0x30   : > { %p837_p1 = pnand %p835_p12, %p795_p3  ;;  %s841_s11 = scalar_lea.vmem %s840_s29, 256 }
  0x31   : > { %p842_p5 = scmp.lt.s32.totalorder %s206_s26, %s840_s29  ;;  %p843_p6 = scmp.lt.s32.totalorder %s841_s11, %s834_s12 }
  0x32   : > { %p838_p2 = pneg %p837_p1 }
  0x33   : > { %p844_p7 = por %p843_p6, %p842_p5 }
  0x35   : > { %p845_p10 = pnand %p844_p7, %p838_p2 }
  0x37   : > { %848 = shalt.err (!%p845_p10)
}
  0x38   : > { %723 = dma.hbm_to_vmem [thread:$0]  (!%p1103_p0), %s203_s24, 128, %s206_s26, %s194_s19  }
  0x39   : > { %s234_s23 = scalar_lea.vmem [#allocation7], %s1096_s6  ;;  %s995_s25 = smov [#allocation7]  }
  0x3a   : > { %s241_s5 = sshll.u32 %s234_s23, 4  ;;  %s867_s29 = sshll.u32 %s995_s25, 4  ;;  %s242_s5 = int_to_ptr.vmem [resolvable:$true] %s241_s5  ;;  %s868_s29 = int_to_ptr.vmem [resolvable:$false] %s867_s29 }
  0x3b   : > { %s862_s13 = scalar_lea.vmem %s242_s5, 128  ;;  %s869_s10 = scalar_lea.vmem %s868_s29, 256 }
  0x3c   : > { %p863_p13 = scmp.ne.s32.totalorder %s242_s5, %s862_s13  ;;  %p870_p2 = scmp.lt.s32.totalorder %s242_s5, %s868_s29 }
  0x3d   : > { %p871_p5 = scmp.lt.s32.totalorder %s869_s10, %s862_s13 }
  0x3e   : > { %p865_p12 = pnand %p863_p13, %p795_p3 }
  0x3f   : > { %p872_p6 = por %p871_p5, %p870_p2 }
  0x40   : > { %p866_p1 = pneg %p865_p12 }
  0x42   : > { %p873_p7 = pnand %p872_p6, %p866_p1 }
  0x44   : > { %876 = shalt.err (!%p873_p7)
}
  0x45   : > { %729 = dma.hbm_to_vmem [thread:$0]  (!%p1103_p0), %s239_s1, 128, %s242_s5, %s1115_s22  }
  0x46   : > { %250 = sbr.rel (%p1129_p4) target bundleno = 797 (0x31d), region = 32  ;;  %s1164_s24 = sand.u32 (!%p1129_p4), 1, %s975_s16  }
  0x47   : > { %s1167_s26 = sshll.u32 (!%p1129_p4), %s1164_s24, 3  ;;  %s253_s8 = scalar_lea.sflag (!%p1129_p4), [#allocation3], %s1164_s24 }
  0x48   : > { %s256_s12 = scalar_lea.vmem (!%p1129_p4), [#allocation2], %s1167_s26 }
  0x4b   : > { %954 = dma.done.wait (%p1076_p8), %s253_s8, 128  }
  0x4c   : > { %956 = vsyncadd (%p1076_p8), %s253_s8, 4294967168  ;;  %s261_s1 = sand.u32 1, %s1056_s21   ;;  %s265_s22 = scalar_lea.vmem [#allocation5], %s1167_s26 }
  0x4d   : > { %s262_s7 = scalar_lea.sflag [#allocation6], %s261_s1 }
  0x4e   : > { %958 = dma.done.wait (%p1076_p8), %s262_s7, 256  }
  0x4f   : > { %960 = vsyncadd (%p1076_p8), %s262_s7, 4294967040  ;;  %v996_v0 = vmov 0.0   ;;  %vm997_vm0 = vmmov 0   ;;  %vm317_vm1 = vcmask 261120   ;;  %v315_v1 = vld [vmem:[%s265_s22] sm:$0xff]  ;;  %v314_v2 = vld [vmem:[%s256_s12] sm:$0xff] }
  0x50   : > { %700 = vmatprep.subr.mxu0 %v996_v0  ;;  %702 = vmatprep.mubr.msk.f32.mxu0 %vm997_vm0, %v996_v0  ;;  %vm394_vm2 = vcmask 64512   ;;  %s274_s21 = scalar_lea.vmem [#allocation7], %s1167_s26  ;;  %s313_s27 = scalar_lea.vmem [#allocation9], %s1167_s26 }
  0x51   : > { %705 = vmatprep.subr.mxu1 %v996_v0  ;;  %707 = vmatprep.mubr.msk.f32.mxu1 %vm997_vm0, %v996_v0  ;;  %v316_v11 = vld [vmem:[%s274_s21] sm:$0xff]  ;;  %s692_s9 = sshll.u32 %s983_s18, 7  ;;  %s515_s5 = sshll.u32 %s313_s27, 4  ;;  %s516_s5 = int_to_ptr.vmem [resolvable:$true] %s515_s5 }
  0x52   : > { %701 = vmatpush3.xpose.msk.msra.mxu0 %vm317_vm1, %v315_v1  ;;  %706 = vmatpush3.msra.mxu1 %v316_v11  ;;  %s513_s23 = scalar_lea.hbm %s1267_s4, %s692_s9  ;;  %s487_s13 = scalar_lea.sflag [#allocation10], %s1164_s24 }
  0x53   : > { %s877_s25 = scalar_lea.vmem %s516_s5, 128  ;;  %s998_s29 = smov [#allocation9]  }
  0x54   : > { %p878_p8 = scmp.ne.s32.totalorder %s516_s5, %s877_s25  ;;  %s881_s10 = sshll.u32 %s998_s29, 4  ;;  %s882_s10 = int_to_ptr.vmem [resolvable:$false] %s881_s10 }
  0x55   : > { %703 = vmatmul.mubr.msk.f32.vlgmr.msra.gmra.mxu0 %vm317_vm1, %v314_v2  ;;  %s883_s19 = scalar_lea.vmem %s882_s10, 256  ;;  %p884_p4 = scmp.lt.s32.totalorder %s516_s5, %s882_s10 }
  0x56   : > { %p879_p0 = pnand %p878_p8, %p1080_p9  ;;  %p885_p10 = scmp.lt.s32.totalorder %s883_s19, %s877_s25 }
  0x58   : > { %p880_p3 = pneg %p879_p0  ;;  %p886_p13 = por %p885_p10, %p884_p4 }
  0x5a   : > { %p887_p12 = pnand %p886_p13, %p880_p3 }
 0x115   : > { %v390_v3 = vpop.f32.mrf.mxu0 }
 0x116   : > { %v395_v4 = vsel %vm394_vm2, %v390_v3, -inf }
 0x117   : > { %396 = vmax.xlane.f32.xlu0 %v395_v4  ;;  %v704_v5 = vpop.f32.mrf.mxu0 }
 0x1a0   : > { %v397_v6 = vpop.xlane.xlu0 %396 }
 0x1a1   : > { %v398_v7 = vsub.f32 %v390_v3, %v397_v6 }
 0x1a3   : > { %v399_v8 = vmul.f32 1.442695, %v398_v7 }
 0x1a5   : > { %789 = vpow2.f32 %v399_v8 }
 0x1b2   : > { %v790_v9 = vpop.eup %789 }
 0x1b3   : > { %v401_v10 = vsel %vm394_vm2, %v790_v9, 0.0 }
 0x1b4   : > { %402 = vadd.xlane.f32.xlu0 %v401_v10 }
 0x23d   : > { %v403_v12 = vpop.xlane.xlu0 %402 }
 0x23e   : > { %791 = vrcp.f32 %v403_v12 }
 0x24b   : > { %v792_v13 = vpop.eup %791 }
 0x24c   : > { %v405_v14 = vmul.f32 %v792_v13, %v790_v9 }
 0x24e   : > { %708 = vmatmul.mubr.msk.f32.vlgmr.msra.gmra.mxu1 %vm394_vm2, %v405_v14  ;;  %480 = vst.msk [vmem:[%s313_s27] sm:$0xff] %vm394_vm2, %v405_v14 }
 0x24f   : > { %890 = shalt.err (!%p887_p12)
}
 0x250   : > { %s891_s6 = scalar_lea.hbm %s513_s23, 128  ;;  %s895_s1 = scalar_lea.hbm %s1267_s4, 256 }
 0x251   : > { %p892_p1 = scmp.ne.s32.totalorder %s513_s23, %s891_s6  ;;  %p896_p6 = scmp.lt.s32.totalorder %s513_s23, %s1267_s4 }
 0x252   : > { %p897_p7 = scmp.lt.s32.totalorder %s895_s1, %s891_s6 }
 0x253   : > { %p893_p2 = pnand %p892_p1, %p1080_p9 }
 0x254   : > { %p898_p8 = por %p897_p7, %p896_p6 }
 0x255   : > { %p894_p5 = pneg %p893_p2 }
 0x257   : > { %p899_p0 = pnand %p898_p8, %p894_p5 }
 0x259   : > { %902 = shalt.err (!%p899_p0)
}
 0x25a   : > { %717 = dma.vmem_to_hbm [thread:$0]  (%p1080_p9), %s516_s5, 128, %s513_s23, %s487_s13  }
 0x25b   : > { %s306_s21 = scalar_lea.vmem [#allocation8], %s1167_s26  ;;  %s1214_s25 = scalar_lea.hbm %s1266_s3, %s692_s9 }
 0x25c   : > { %s501_s27 = sshll.u32 %s306_s21, 4  ;;  %s482_s29 = scalar_lea.sflag [#allocation4], %s1164_s24  ;;  %s1216_s27 = int_to_ptr.vmem [resolvable:$true] %s501_s27 }
 0x25d   : > { %s903_s10 = scalar_lea.vmem %s1216_s27, 128  ;;  %s999_s18 = smov [#allocation8]  }
 0x25e   : > { %p904_p3 = scmp.ne.s32.totalorder %s1216_s27, %s903_s10  ;;  %s907_s26 = sshll.u32 %s999_s18, 4  ;;  %s908_s26 = int_to_ptr.vmem [resolvable:$false] %s907_s26 }
 0x25f   : > { %s909_s9 = scalar_lea.vmem %s908_s26, 256  ;;  %p910_p13 = scmp.lt.s32.totalorder %s1216_s27, %s908_s26 }
 0x260   : > { %p905_p4 = pnand %p904_p3, %p1080_p9  ;;  %p911_p12 = scmp.lt.s32.totalorder %s909_s9, %s903_s10 }
 0x262   : > { %p906_p10 = pneg %p905_p4  ;;  %p912_p1 = por %p911_p12, %p910_p13 }
 0x264   : > { %p913_p2 = pnand %p912_p1, %p906_p10 }
 0x30e   : > { %v475_v15 = vpop.f32.mrf.mxu1 }
 0x30f   : > { %479 = vst.msk [vmem:[%s306_s21] sm:$0xff] %vm317_vm1, %v475_v15 }
 0x310   : > { %v709_v16 = vpop.f32.mrf.mxu1 }
 0x311   : > { %916 = shalt.err (!%p913_p2)
}
 0x312   : > { %s917_s23 = scalar_lea.hbm %s1214_s25, 128  ;;  %s921_s13 = scalar_lea.hbm %s1266_s3, 256 }
 0x313   : > { %p918_p5 = scmp.ne.s32.totalorder %s1214_s25, %s917_s23  ;;  %p922_p8 = scmp.lt.s32.totalorder %s1214_s25, %s1266_s3 }
 0x314   : > { %p923_p0 = scmp.lt.s32.totalorder %s921_s13, %s917_s23 }
 0x315   : > { %p919_p6 = pnand %p918_p5, %p1080_p9 }
 0x316   : > { %p924_p3 = por %p923_p0, %p922_p8 }
 0x317   : > { %p920_p7 = pneg %p919_p6 }
 0x319   : > { %p925_p4 = pnand %p924_p3, %p920_p7 }
 0x31b   : > { %928 = shalt.err (!%p925_p4)
}
 0x31c   : > { %716 = dma.vmem_to_hbm [thread:$0]  (%p1080_p9), %s1216_s27, 128, %s1214_s25, %s482_s29  }
 0x31d PF: > { %s527_s8 = sand.u32 1, %s971_s15   ;;  %p1283_p10 = scmp.ge.s32.totalorder %s991_s20, 2 }
 0x31e   : > { %s528_s12 = scalar_lea.sflag [#allocation4], %s527_s8 }
 0x31f   : > { %p731_p13 = pnand %p1283_p10, %p1087_p11 }
 0x321   : > { %p732_p12 = pneg %p731_p13 }
 0x323   : > { %962 = dma.done.wait (%p732_p12), %s528_s12, 128  }
 0x324   : > { %964 = vsyncadd (%p732_p12), %s528_s12, 4294967168  ;;  %s537_s1 = scalar_lea.sflag [#allocation10], %s527_s8 }
 0x325   : > { %966 = dma.done.wait (%p732_p12), %s537_s1, 128  }
 0x326   : > { %968 = vsyncadd (%p732_p12), %s537_s1, 4294967168  ;;  %s27_s20 = sadd.s32 1, %s991_s20   ;;  %s1284_s28 = sld [smem:[#allocation17_spill]] }
 0x327   : > { %p24_p1 = scmp.ge.s32.totalorder %s27_s20, 4   ;;  %s1285_s18 = sld [smem:[#allocation15_spill]] }
 0x328   : > { %s1286_s19 = sld [smem:[#allocation16_spill]]  ;;  %s1287_s15 = smov %s975_s16 }
 0x329   : > { %s1288_s16 = smov %s979_s17  ;;  %26 = sbr.rel (!%p24_p1) target bundleno = 12 (0xc), region = 118 }
 0x32c   : > { %s1289_s17 = smov %s1284_s28 }
 0x32e   :  { %542 = vsyncpa [#allocation3], 1 }
 0x32f   :  { %544 = vsyncpa [#allocation3 + $0x1], 1 }
 0x330   :  { %545 = vsyncpa [#allocation6], 1 }
 0x331   :  { %547 = vsyncpa [#allocation6 + $0x1], 1 }
 0x332   :  { %548 = vsyncpa [#allocation4], 1 }
 0x333   :  { %550 = vsyncpa [#allocation4 + $0x1], 1 }
 0x334   :  { %551 = vsyncpa [#allocation10], 1 }
 0x335   :  { %553 = vsyncpa [#allocation10 + $0x1], 1 }

</bundles_post_ra>
